<compile_context>
chip_gen: v7x
topology: tpu7x:2x2x1
jax: 0.10.0
libtpu: 0.0.40
codegen_flags: <defaults>
</compile_context>

<pallas_src>
import jax
import jax.numpy as jnp
from jax.experimental import pallas as pl
from jax.experimental.pallas import tpu as pltpu


# ----------------------------------------------------------------------------
# Kernels: raw HBM refs, single direct HBM->HBM DMA per tensor.
# ----------------------------------------------------------------------------
def _dma_flatten_kernel(x_hbm, o_hbm, sem):
    # One DMA: HBM read once, HBM written once.  No VMEM staging.
    cp = pltpu.make_async_copy(x_hbm, o_hbm, sem)
    cp.start()
    cp.wait()


def _dma_flatten2_kernel(u_hbm, l_hbm, ou_hbm, ol_hbm, sem):
    # Fused upper/lower bound copy: two DMAs in flight, one kernel launch.
    cp_u = pltpu.make_async_copy(u_hbm, ou_hbm, sem.at[0])
    cp_l = pltpu.make_async_copy(l_hbm, ol_hbm, sem.at[1])
    cp_u.start()
    cp_l.start()
    cp_u.wait()
    cp_l.wait()


# ----------------------------------------------------------------------------
# Wrappers mirroring the PyTorch module.
# ----------------------------------------------------------------------------
def _flat_dim(shape) -> int:
    flat = 1
    for d in shape[1:]:
        flat *= d
    return flat


@jax.jit
def bound_flatten(x: jax.Array) -> jax.Array:
    """Forward pass of BoundFlatten: (N, C, H, W) -> (N, C*H*W)."""
    n = x.shape[0]
    flat = _flat_dim(x.shape)

    # Free, metadata-only reshape; the kernel only sees a 2-D slab and the
    # DMA copies it verbatim.
    x2d = jnp.reshape(x, (n, flat))

    nbytes = n * flat * jnp.dtype(x.dtype).itemsize
    return pl.pallas_call(
        _dma_flatten_kernel,
        out_shape=jax.ShapeDtypeStruct((n, flat), x.dtype),
        in_specs=[pl.BlockSpec(memory_space=pl.ANY)],
        out_specs=pl.BlockSpec(memory_space=pl.ANY),
        scratch_shapes=[pltpu.SemaphoreType.DMA(())],
        cost_estimate=pl.CostEstimate(
            flops=0, transcendentals=0, bytes_accessed=2 * nbytes),
    )(x2d)


@jax.jit
def _interval_propagate_impl(h_U: jax.Array, h_L: jax.Array):
    n = h_U.shape[0]
    flat = _flat_dim(h_U.shape)

    u2d = jnp.reshape(h_U, (n, flat))
    l2d = jnp.reshape(h_L, (n, flat))

    out_sds = jax.ShapeDtypeStruct((n, flat), h_U.dtype)
    nbytes = n * flat * jnp.dtype(h_U.dtype).itemsize
    return pl.pallas_call(
        _dma_flatten2_kernel,
        out_shape=(out_sds, out_sds),
        in_specs=[pl.BlockSpec(memory_space=pl.ANY),
                  pl.BlockSpec(memory_space=pl.ANY)],
        out_specs=(pl.BlockSpec(memory_space=pl.ANY),
                   pl.BlockSpec(memory_space=pl.ANY)),
        scratch_shapes=[pltpu.SemaphoreType.DMA((2,))],
        cost_estimate=pl.CostEstimate(
            flops=0, transcendentals=0, bytes_accessed=4 * nbytes),
    )(u2d, l2d)


def bound_flatten_interval_propagate(h_U: jax.Array, h_L: jax.Array, eps=None):
    """interval_propagate: flatten both bounds in ONE fused pallas_call."""
    assert h_U.shape == h_L.shape and h_U.dtype == h_L.dtype
    del eps  # unused, matches the reference semantics
    return _interval_propagate_impl(h_U, h_L)


if __name__ == "__main__":
    key = jax.random.PRNGKey(0)
    k_x, k_u, k_l = jax.random.split(key, 3)

    # Small NCHW input consistent with the module's usage in conv nets.
    x = jax.random.normal(k_x, (2, 4, 16, 16), dtype=jnp.float32)

    y = bound_flatten(x)
    jax.block_until_ready(y)

    # Reference check against plain JAX reshape (== torch .view(N, -1)).
    y_ref = x.reshape(x.shape[0], -1)
    assert y.shape == (2, 4 * 16 * 16), y.shape
    assert jnp.array_equal(y, y_ref), "flatten mismatch"

    # Fused interval_propagate path (single launch, two concurrent DMAs).
    h_U = jax.random.normal(k_u, (2, 4, 16, 16), dtype=jnp.float32)
    h_L = jax.random.normal(k_l, (2, 4, 16, 16), dtype=jnp.float32)
    u_flat, l_flat = bound_flatten_interval_propagate(h_U, h_L, eps=0.1)
    jax.block_until_ready((u_flat, l_flat))
    assert jnp.array_equal(u_flat, h_U.reshape(2, -1))
    assert jnp.array_equal(l_flat, h_L.reshape(2, -1))

    print("KERNEL_OK")
</pallas_src>

<mosaic_0001>
module attributes {stable_mosaic.version = 11 : i64} {
  func.func @_dma_flatten_kernel(%arg0: memref<2x1024xf32, #tpu.memory_space<any>>, %arg1: memref<2x1024xf32, #tpu.memory_space<any>>, %arg2: memref<!tpu.dma_semaphore, #tpu.memory_space<semaphore_mem>>) attributes {dimension_semantics = [], scalar_prefetch = 0 : i64, scratch_operands = 1 : i64, tpu.core_type = #tpu.core_type<tc>} {
    tpu.enqueue_dma source(%arg0 : memref<2x1024xf32, #tpu.memory_space<any>>) target(%arg1 : memref<2x1024xf32, #tpu.memory_space<any>>) target_semaphore(%arg2 : memref<!tpu.dma_semaphore, #tpu.memory_space<semaphore_mem>>)
    tpu.wait_dma2 semaphore(%arg2 : memref<!tpu.dma_semaphore, #tpu.memory_space<semaphore_mem>>) src(%arg0 : memref<2x1024xf32, #tpu.memory_space<any>>) dst(%arg1 : memref<2x1024xf32, #tpu.memory_space<any>>)
    return
  }
}

</mosaic_0001>

<bundles_post_ra>
// kernel: bound_flatten.1
= control target key start
LH: loop header
LB: loop body
LE: loop exit
PB: predicated region body
PF: predicated region fallthrough
CT: control target
= control target key end

     0   :  { %s77_s0 = inlined_call_operand.vmem [shape: f32[2,1024], index: 0, kind: input, shape index: {}]   ;;  %s78_s1 = inlined_call_operand.hbm [shape: f32[2,1024], index: 1, kind: output, shape index: {}]  }
   0x1   :  { %s13_s8 = sshll.u32 %s77_s0, 4  ;;  %s14_s8 = int_to_ptr.vmem [resolvable:$true] %s13_s8 }
   0x2   :  { %s28_s9 = scalar_lea.vmem %s14_s8, 256  ;;  %p33_p1 = scmp.lt.s32.totalorder %s14_s8, %s14_s8 }
   0x3   :  { %p29_p0 = scmp.ne.s32.totalorder %s14_s8, %s28_s9  ;;  %p34_p2 = scmp.lt.s32.totalorder %s28_s9, %s28_s9 }
   0x5   :  { %p35_p3 = por %p34_p2, %p33_p1 }
   0x7   :  { %p36_p4 = pnand %p35_p3, %p29_p0 }
   0x9   :  { %39 = shalt.err (!%p36_p4)  }
   0xa   :  { %s40_s12 = scalar_lea.hbm %s78_s1, 256 }
   0xb   :  { %p41_p5 = scmp.ne.s32.totalorder %s78_s1, %s40_s12  ;;  %p44_p6 = scmp.lt.u32.totalorder %s40_s12, %s78_s1 }
   0xd   :  { %p46_p7 = pnand %p44_p6, %p41_p5 }
   0xf   :  { %49 = shalt.err (!%p46_p7)  }
  0x10   :  { %16 = dma.vmem_to_hbm [thread:$0]  %s14_s8, 256, %s78_s1, [#allocation2] }
  0x11   :  { %50 = dma.done.wait [#allocation2], 256 }
  0x12   :  { %51 = vsyncadd [#allocation2], 4294967040 }
  0x13   :  { %21 = vsyncmov [#allocation2] }
  0x16   :  { %s22_s18 = vpop.sfrf %21 }
  0x17   :  { %p27_p8 = scmp.ne.s32.totalorder %s22_s18, 0 }
  0x19   :  { %26 = shalt.err (%p27_p8)  }

</bundles_post_ra>
